<compile_context>
chip_gen: v7x
topology: tpu7x:2x2x1
jax: 0.10.0
libtpu: 0.0.40
codegen_flags: <defaults>
</compile_context>

<pallas_src>
import math

import jax
import jax.numpy as jnp
from jax import lax
from jax.experimental import pallas as pl
from jax.experimental.pallas import tpu as pltpu  # noqa: F401  (kept for TPU memory-space use)


def _attn_kernel(q_ref, k_ref, v_ref, mask_ref, o_ref):
    B = q_ref.shape[0]
    D = q_ref.shape[-1]
    scale = 1.0 / math.sqrt(D)
    m = mask_ref[0]                     # (S, S), broadcast over batch

    # B=2: static unroll into plain 2-D MXU matmuls (no batch-dim dot_general).
    for b in range(B):
        q = q_ref[b] * scale            # (S, D) — scale folded into Q
        k = k_ref[b]                    # (S, D)
        v = v_ref[b]                    # (S, D)

        # Q @ K^T: contraction over the last dim of BOTH operands
        # ("NT" matmul) — no explicit K transpose / XLU relayout.
        s = lax.dot_general(
            q, k, (((1,), (1,)), ((), ())),
            preferred_element_type=jnp.float32) + m      # (S, S)

        # numerically stable softmax over the last axis (exact divide)
        s_max = jnp.max(s, axis=-1, keepdims=True)
        p = jnp.exp(s - s_max)
        denom = jnp.sum(p, axis=-1, keepdims=True)
        attn = p / denom

        # output = attn @ V
        o_ref[b] = jnp.dot(
            attn.astype(v.dtype), v,
            preferred_element_type=jnp.float32).astype(o_ref.dtype)


def sdpa_pallas(q, k, v, mask):
    B, S, D = q.shape
    assert k.shape == (B, S, D) and v.shape == (B, S, D)
    assert mask.shape == (1, S, S)

    # Advisory cost hint: 2 matmuls of 2*S*S*D flops each per batch element,
    # S*S exponentials per batch element, ~70 KiB of HBM traffic total.
    cost = pl.CostEstimate(
        flops=4 * B * S * S * D,
        transcendentals=B * S * S,
        bytes_accessed=(4 * B * S * D + S * S) * 4,
    )

    # Single kernel invocation (no grid): all blocks are full arrays in VMEM.
    return pl.pallas_call(
        _attn_kernel,
        out_shape=jax.ShapeDtypeStruct((B, S, D), q.dtype),
        in_specs=[
            pl.BlockSpec((B, S, D), lambda: (0, 0, 0)),   # Q
            pl.BlockSpec((B, S, D), lambda: (0, 0, 0)),   # K
            pl.BlockSpec((B, S, D), lambda: (0, 0, 0)),   # V
            pl.BlockSpec((1, S, S), lambda: (0, 0, 0)),   # mask (broadcast)
        ],
        out_specs=pl.BlockSpec((B, S, D), lambda: (0, 0, 0)),
        cost_estimate=cost,
    )(q, k, v, mask)


def sdpa_ref(q, k, v, mask):
    d = q.shape[-1]
    s = jnp.einsum("bqd,bkd->bqk", q, k,
                   precision=lax.Precision.HIGHEST) / math.sqrt(d) + mask
    p = jax.nn.softmax(s, axis=-1)
    return jnp.einsum("bqk,bkd->bqd", p, v,
                      precision=lax.Precision.HIGHEST)


if __name__ == "__main__":
    key = jax.random.PRNGKey(0)
    kq, kk, kv, km = jax.random.split(key, 4)

    B, S, D = 2, 56, 32   # mask in the source module is (1, 56, 56)
    q = jax.random.normal(kq, (B, S, D), dtype=jnp.float32)
    k = jax.random.normal(kk, (B, S, D), dtype=jnp.float32)
    v = jax.random.normal(kv, (B, S, D), dtype=jnp.float32)
    # additive mask: -1e9 where rand > 0.7, else 0
    mask = jnp.where(jax.random.uniform(km, (1, S, S)) > 0.7,
                     jnp.float32(-1e9), jnp.float32(0.0))

    out = sdpa_pallas(q, k, v, mask)
    out = jax.block_until_ready(out)

    ref = sdpa_ref(q, k, v, mask)
    # exact divide in-kernel -> tight tolerance (MXU f32 multi-pass matmul
    # vs HIGHEST-precision XLA dot leaves only ~1e-6-level differences)
    assert jnp.allclose(out, ref, atol=1e-4, rtol=1e-4), "mismatch vs reference"

    print("KERNEL_OK")
</pallas_src>

<mosaic_0001>
module attributes {stable_mosaic.version = 11 : i64} {
  func.func @_attn_kernel(%arg0: memref<2x56x32xf32, #tpu.memory_space<vmem>>, %arg1: memref<2x56x32xf32, #tpu.memory_space<vmem>>, %arg2: memref<2x56x32xf32, #tpu.memory_space<vmem>>, %arg3: memref<1x56x56xf32, #tpu.memory_space<vmem>>, %arg4: memref<2x56x32xf32, #tpu.memory_space<vmem>>) attributes {dimension_semantics = [], scalar_prefetch = 0 : i64, scratch_operands = 0 : i64, tpu.core_type = #tpu.core_type<tc>} {
    %c0 = arith.constant 0 : index
    %c0_0 = arith.constant 0 : index
    %c0_1 = arith.constant 0 : index
    %0 = vector.load %arg3[%c0, %c0_0, %c0_1] : memref<1x56x56xf32, #tpu.memory_space<vmem>>, vector<1x56x56xf32>
    %1 = vector.shape_cast %0 : vector<1x56x56xf32> to vector<56x56xf32>
    %c0_2 = arith.constant 0 : index
    %c0_3 = arith.constant 0 : index
    %c0_4 = arith.constant 0 : index
    %2 = vector.load %arg0[%c0_2, %c0_3, %c0_4] : memref<2x56x32xf32, #tpu.memory_space<vmem>>, vector<1x56x32xf32>
    %3 = vector.shape_cast %2 : vector<1x56x32xf32> to vector<56x32xf32>
    %cst = arith.constant 0.176776692 : f32
    %4 = vector.broadcast %cst : f32 to vector<56x32xf32>
    %5 = arith.mulf %3, %4 : vector<56x32xf32>
    %c0_5 = arith.constant 0 : index
    %c0_6 = arith.constant 0 : index
    %c0_7 = arith.constant 0 : index
    %6 = vector.load %arg1[%c0_5, %c0_6, %c0_7] : memref<2x56x32xf32, #tpu.memory_space<vmem>>, vector<1x56x32xf32>
    %7 = vector.shape_cast %6 : vector<1x56x32xf32> to vector<56x32xf32>
    %c0_8 = arith.constant 0 : index
    %c0_9 = arith.constant 0 : index
    %c0_10 = arith.constant 0 : index
    %8 = vector.load %arg2[%c0_8, %c0_9, %c0_10] : memref<2x56x32xf32, #tpu.memory_space<vmem>>, vector<1x56x32xf32>
    %9 = vector.shape_cast %8 : vector<1x56x32xf32> to vector<56x32xf32>
    %cst_11 = arith.constant dense<0.000000e+00> : vector<56x56xf32>
    %10 = tpu.matmul %5, %7, %cst_11 {dimension_numbers = #tpu.dot_dimension_numbers<[1], [1], [0], [0], [0, 0, 1, 0], [], []>} : vector<56x32xf32>, vector<56x32xf32>, vector<56x56xf32> -> vector<56x56xf32>
    %11 = arith.addf %10, %1 : vector<56x56xf32>
    %cst_12 = arith.constant dense<0xFF800000> : vector<56xf32>
    %12 = vector.multi_reduction <maximumf>, %11, %cst_12 [1] : vector<56x56xf32> to vector<56xf32>
    %13 = vector.shape_cast %12 : vector<56xf32> to vector<56x1xf32>
    %14 = vector.broadcast %13 : vector<56x1xf32> to vector<56x56xf32>
    %15 = arith.subf %11, %14 : vector<56x56xf32>
    %16 = math.exp %15 : vector<56x56xf32>
    %cst_13 = arith.constant dense<0.000000e+00> : vector<56xf32>
    %17 = vector.multi_reduction <add>, %16, %cst_13 [1] : vector<56x56xf32> to vector<56xf32>
    %18 = vector.shape_cast %17 : vector<56xf32> to vector<56x1xf32>
    %19 = vector.broadcast %18 : vector<56x1xf32> to vector<56x56xf32>
    %20 = arith.divf %16, %19 : vector<56x56xf32>
    %cst_14 = arith.constant dense<0.000000e+00> : vector<56x32xf32>
    %21 = tpu.matmul %20, %9, %cst_14 {dimension_numbers = #tpu.dot_dimension_numbers<[1], [0], [0], [1], [0, 0, 1, 1], [], []>} : vector<56x56xf32>, vector<56x32xf32>, vector<56x32xf32> -> vector<56x32xf32>
    %c0_15 = arith.constant 0 : index
    %c0_16 = arith.constant 0 : index
    %c0_17 = arith.constant 0 : index
    %22 = vector.load %arg4[%c0_15, %c0_16, %c0_17] : memref<2x56x32xf32, #tpu.memory_space<vmem>>, vector<1x56x32xf32>
    %23 = vector.shape_cast %22 : vector<1x56x32xf32> to vector<56x32xf32>
    %24 = vector.shape_cast %21 : vector<56x32xf32> to vector<1x56x32xf32>
    tpu.vector_store %arg4[%c0_15, %c0_16, %c0_17], %24 {strides = array<i32>} : memref<2x56x32xf32, #tpu.memory_space<vmem>>, vector<1x56x32xf32>,
    %c1 = arith.constant 1 : index
    %c0_18 = arith.constant 0 : index
    %c0_19 = arith.constant 0 : index
    %25 = vector.load %arg0[%c1, %c0_18, %c0_19] : memref<2x56x32xf32, #tpu.memory_space<vmem>>, vector<1x56x32xf32>
    %26 = vector.shape_cast %25 : vector<1x56x32xf32> to vector<56x32xf32>
    %cst_20 = arith.constant 0.176776692 : f32
    %27 = vector.broadcast %cst_20 : f32 to vector<56x32xf32>
    %28 = arith.mulf %26, %27 : vector<56x32xf32>
    %c1_21 = arith.constant 1 : index
    %c0_22 = arith.constant 0 : index
    %c0_23 = arith.constant 0 : index
    %29 = vector.load %arg1[%c1_21, %c0_22, %c0_23] : memref<2x56x32xf32, #tpu.memory_space<vmem>>, vector<1x56x32xf32>
    %30 = vector.shape_cast %29 : vector<1x56x32xf32> to vector<56x32xf32>
    %c1_24 = arith.constant 1 : index
    %c0_25 = arith.constant 0 : index
    %c0_26 = arith.constant 0 : index
    %31 = vector.load %arg2[%c1_24, %c0_25, %c0_26] : memref<2x56x32xf32, #tpu.memory_space<vmem>>, vector<1x56x32xf32>
    %32 = vector.shape_cast %31 : vector<1x56x32xf32> to vector<56x32xf32>
    %cst_27 = arith.constant dense<0.000000e+00> : vector<56x56xf32>
    %33 = tpu.matmul %28, %30, %cst_27 {dimension_numbers = #tpu.dot_dimension_numbers<[1], [1], [0], [0], [0, 0, 1, 0], [], []>} : vector<56x32xf32>, vector<56x32xf32>, vector<56x56xf32> -> vector<56x56xf32>
    %34 = arith.addf %33, %1 : vector<56x56xf32>
    %cst_28 = arith.constant dense<0xFF800000> : vector<56xf32>
    %35 = vector.multi_reduction <maximumf>, %34, %cst_28 [1] : vector<56x56xf32> to vector<56xf32>
    %36 = vector.shape_cast %35 : vector<56xf32> to vector<56x1xf32>
    %37 = vector.broadcast %36 : vector<56x1xf32> to vector<56x56xf32>
    %38 = arith.subf %34, %37 : vector<56x56xf32>
    %39 = math.exp %38 : vector<56x56xf32>
    %cst_29 = arith.constant dense<0.000000e+00> : vector<56xf32>
    %40 = vector.multi_reduction <add>, %39, %cst_29 [1] : vector<56x56xf32> to vector<56xf32>
    %41 = vector.shape_cast %40 : vector<56xf32> to vector<56x1xf32>
    %42 = vector.broadcast %41 : vector<56x1xf32> to vector<56x56xf32>
    %43 = arith.divf %39, %42 : vector<56x56xf32>
    %cst_30 = arith.constant dense<0.000000e+00> : vector<56x32xf32>
    %44 = tpu.matmul %43, %32, %cst_30 {dimension_numbers = #tpu.dot_dimension_numbers<[1], [0], [0], [1], [0, 0, 1, 1], [], []>} : vector<56x56xf32>, vector<56x32xf32>, vector<56x32xf32> -> vector<56x32xf32>
    %c1_31 = arith.constant 1 : index
    %c0_32 = arith.constant 0 : index
    %c0_33 = arith.constant 0 : index
    %45 = vector.load %arg4[%c1_31, %c0_32, %c0_33] : memref<2x56x32xf32, #tpu.memory_space<vmem>>, vector<1x56x32xf32>
    %46 = vector.shape_cast %45 : vector<1x56x32xf32> to vector<56x32xf32>
    %47 = vector.shape_cast %44 : vector<56x32xf32> to vector<1x56x32xf32>
    tpu.vector_store %arg4[%c1_31, %c0_32, %c0_33], %47 {strides = array<i32>} : memref<2x56x32xf32, #tpu.memory_space<vmem>>, vector<1x56x32xf32>,
    return
  }
}

</mosaic_0001>

<bundles_post_ra>
// kernel: tpu_custom_call.1
= control target key start
LH: loop header
LB: loop body
LE: loop exit
PB: predicated region body
PF: predicated region fallthrough
CT: control target
= control target key end

     0   :  { %vm52_vm0 = vcmask 261120   ;;  %v1159_v0 = vmov 0.0|0.0   ;;  %vm1160_vm2 = vmmov 0   ;;  %v1161_v4 = vmov 0.0   ;;  %s1570_s1 = inlined_call_operand.vmem [shape: f32[2,56,32], index: 1, kind: input, shape index: {}]   ;;  %s1571_s0 = inlined_call_operand.vmem [shape: f32[2,56,32], index: 0, kind: input, shape index: {}]   ;;  %s1572_s3 = inlined_call_operand.vmem [shape: f32[1,56,56], index: 3, kind: input, shape index: {}]   ;;  %s1573_s2 = inlined_call_operand.vmem [shape: f32[2,56,32], index: 2, kind: input, shape index: {}]   ;;  %s1574_s4 = inlined_call_operand.vmem [shape: f32[2,56,32], index: 4, kind: output, shape index: {}]  }
   0x1   :  { %1050 = vmatprep.subr.bf16.mxu0 %v1159_v0  ;;  %v38_v1 = vld [vmem:[%s1570_s1] sm:$0xff]  ;;  %v39_v2 = vld [vmem:[%s1570_s1 + $0x8] sm:$0xff]  ;;  %vm1196_vm1 = vmpackc.low %vm52_vm0, %vm52_vm0  ;;  %924 = vmatprep.mubr.msk.f32.mxu0 %vm1160_vm2, %v1161_v4  ;;  %vm195_vm3 = vcmask 457728  }
   0x2   :  { %v1051_v5 = vpack.c.bf16 %v39_v2, %v38_v1  ;;  %1062 = vmatprep.subr.bf16.mxu1 %v1159_v0  ;;  %959 = vmatprep.mubr.msk.f32.mxu1 %vm1160_vm2, %v1161_v4  ;;  %v40_v6 = vld [vmem:[%s1570_s1 + $0x10] sm:$0xff]  ;;  %v41_v7 = vld [vmem:[%s1570_s1 + $0x18] sm:$0xff]  ;;  %v42_v9 = vld [vmem:[%s1570_s1 + $0x20] sm:$0xff] }
   0x3   :  { %v1055_v8 = vpack.c.bf16 %v41_v7, %v40_v6  ;;  %v43_v10 = vld [vmem:[%s1570_s1 + $0x28] sm:$0xff]  ;;  %v24_v12 = vld [vmem:[%s1571_s0] sm:$0xff]  ;;  %v44_v13 = vld [vmem:[%s1570_s1 + $0x30] sm:$0xff] }
   0x4   :  { %1053 = vmatpush3.bf16.xpose.msk.msra.mxu0 %vm1196_vm1, %v1051_v5  ;;  %v1059_v11 = vpack.c.bf16 %v43_v10, %v42_v9  ;;  %v31_v14 = vmul.f32 0.17677669, %v24_v12  ;;  %v25_v15 = vld [vmem:[%s1571_s0 + $0x8] sm:$0xff]  ;;  %v26_v17 = vld [vmem:[%s1571_s0 + $0x10] sm:$0xff]  ;;  %v27_v19 = vld [vmem:[%s1571_s0 + $0x18] sm:$0xff] }
   0x5   :  { %1054 = vmatprep.subr.bf16.mxu0 %v1159_v0  ;;  %v32_v16 = vmul.f32 0.17677669, %v25_v15  ;;  %v33_v18 = vmul.f32 0.17677669, %v26_v17  ;;  %v34_v20 = vmul.f32 0.17677669, %v27_v19 }
   0x6   :  { %v28_v21 = vld [vmem:[%s1571_s0 + $0x20] sm:$0xff]  ;;  %v29_v23 = vld [vmem:[%s1571_s0 + $0x28] sm:$0xff]  ;;  %v30_v25 = vld [vmem:[%s1571_s0 + $0x30] sm:$0xff] }
   0x7   :  { %v35_v22 = vmul.f32 0.17677669, %v28_v21  ;;  %v36_v24 = vmul.f32 0.17677669, %v29_v23  ;;  %v37_v26 = vmul.f32 0.17677669, %v30_v25 }
   0x8   :  { %v1276_v27 = vld [vmem:[%s1572_s3] sm:$0xff]  ;;  %v1282_v31 = vld [vmem:[%s1572_s3 + $0x8] sm:$0xff]  ;;  %v1289_v36 = vld [vmem:[%s1572_s3 + $0x10] sm:$0xff] }
   0x9   :  { %v1296_v41 = vld [vmem:[%s1572_s3 + $0x18] sm:$0xff]  ;;  %v1303_v46 = vld [vmem:[%s1572_s3 + $0x20] sm:$0xff]  ;;  %v1310_v51 = vld [vmem:[%s1572_s3 + $0x28] sm:$0xff] }
   0xa   :  { %v1317_v56 = vld [vmem:[%s1572_s3 + $0x30] sm:$0xff]  ;;  %v45_v62 = vld [vmem:[%s1573_s2] sm:$0xff]  ;;  %v46_v63 = vld [vmem:[%s1573_s2 + $0x8] sm:$0xff] }
   0xb   :  { %v47_v1 = vld [vmem:[%s1573_s2 + $0x10] sm:$0xff]  ;;  %v1063_v2 = vpack.c.bf16 %v46_v63, %v45_v62  ;;  %v48_v5 = vld [vmem:[%s1573_s2 + $0x18] sm:$0xff]  ;;  %v818_v3 = vld [vmem:[%s1570_s1 + $0x68] sm:$0xff] }
   0xc   :  { %1057 = vmatpush3.bf16.xpose.msk.msra.mxu0 %vm1196_vm1, %v1055_v8  ;;  %v1066_v6 = vpack.c.bf16 %v48_v5, %v47_v1  ;;  %v815_v5 = vld [vmem:[%s1570_s1 + $0x50] sm:$0xff] }
   0xd   :  { %1058 = vmatprep.subr.bf16.mxu0 %v1159_v0  ;;  %1064 = vmatpush3.bf16.msra.mxu1 %v1063_v2  ;;  %v814_v2 = vld [vmem:[%s1570_s1 + $0x48] sm:$0xff] }
   0xe   :  { %1065 = vmatprep.subr.bf16.mxu1 %v1159_v0 }
  0x11   :  { %1067 = vmatpush3.bf16.msra.mxu1 %v1066_v6 }
  0x12   :  { %1068 = vmatprep.subr.bf16.mxu1 %v1159_v0 }
  0x14   :  { %1061 = vmatpush3.bf16.xpose.msk.msra.mxu0 %vm1196_vm1, %v1059_v11 }
  0x15   :  { %922 = vmatprep.subr.mxu0 %v1161_v4 }
  0x1c   :  { %923 = vmatpush3.xpose.msk.msra.mxu0 %vm52_vm0, %v44_v13 }
  0x1d   :  { %1083 = vmatprep.subr.bf16.mxu0 %v1159_v0 }
  0x1f   :  { %925 = vmatmul.mubr.msk.f32.vlgmr.msra.gmra.mrb[0].mxu0 %vm52_vm0, %v31_v14 }
  0x20   :  { %927 = vmatprep.mubr.msk.f32.mxu0 %vm1160_vm2, %v1161_v4 }
  0x23   :  { %928 = vmatmul.mubr.msk.f32.gmra.mrb[2].mxu0 %vm52_vm0, %v32_v16 }
  0x24   :  { %930 = vmatprep.mubr.msk.f32.mxu0 %vm1160_vm2, %v1161_v4 }
  0x27   :  { %931 = vmatmul.mubr.msk.f32.gmra.mrb[4].mxu0 %vm52_vm0, %v33_v18 }
  0x28   :  { %933 = vmatprep.mubr.msk.f32.mxu0 %vm1160_vm2, %v1161_v4 }
  0x2b   :  { %934 = vmatmul.mubr.msk.f32.gmra.mrb[6].mxu0 %vm52_vm0, %v34_v20 }
  0x2c   :  { %936 = vmatprep.mubr.msk.f32.mxu0 %vm1160_vm2, %v1161_v4 }
  0x2f   :  { %937 = vmatmul.mubr.msk.f32.gmra.mrb[8].mxu0 %vm52_vm0, %v35_v22 }
  0x30   :  { %939 = vmatprep.mubr.msk.f32.mxu0 %vm1160_vm2, %v1161_v4 }
  0x33   :  { %940 = vmatmul.mubr.msk.f32.gmra.mrb[10].mxu0 %vm52_vm0, %v36_v24 }
  0x34   :  { %942 = vmatprep.mubr.msk.f32.mxu0 %vm1160_vm2, %v1161_v4 }
  0x37   :  { %943 = vmatmul.mubr.msk.f32.gmra.mrb[12].mxu0 %vm52_vm0, %v37_v26 }
  0x38   :  { %1029 = vmatprep.mubr.msk.f32.mxu0 %vm1160_vm2, %v1161_v4 }
  0xf2   :  { %v161_v28 = vpop.f32.mrb[0].mxu0 }
  0xf3   :  { %v162_v29 = vadd.f32 %v161_v28, %v1276_v27  ;;  %v926_v30 = vpop.f32.mrb[1].mxu0 }
  0xf5   :  { %v196_v32 = vsel %vm195_vm3, %v162_v29, -inf }
  0xf6   :  { %197 = vmax.xlane.f32.xlu0 %v196_v32  ;;  %v166_v33 = vpop.f32.mrb[2].mxu0 }
  0xf7   :  { %v167_v34 = vadd.f32 %v166_v33, %v1282_v31  ;;  %v929_v35 = vpop.f32.mrb[3].mxu0 }
  0xf9   :  { %v199_v37 = vsel %vm195_vm3, %v167_v34, -inf }
  0xfa   :  { %200 = vmax.xlane.f32.xlu0 %v199_v37  ;;  %v171_v38 = vpop.f32.mrb[4].mxu0 }
  0xfb   :  { %v172_v39 = vadd.f32 %v171_v38, %v1289_v36  ;;  %v932_v40 = vpop.f32.mrb[5].mxu0 }
  0xfc   :  { %v49_v40 = vld [vmem:[%s1573_s2 + $0x20] sm:$0xff] }
  0xfd   :  { %v202_v42 = vsel %vm195_vm3, %v172_v39, -inf }
  0xfe   :  { %203 = vmax.xlane.f32.xlu1 %v202_v42  ;;  %v176_v43 = vpop.f32.mrb[6].mxu0  ;;  %v50_v42 = vld [vmem:[%s1573_s2 + $0x28] sm:$0xff] }
  0xff   :  { %v177_v44 = vadd.f32 %v176_v43, %v1296_v41  ;;  %v935_v45 = vpop.f32.mrb[7].mxu0 }
 0x101   :  { %v205_v47 = vsel %vm195_vm3, %v177_v44, -inf }
 0x102   :  { %206 = vmax.xlane.f32.xlu1 %v205_v47  ;;  %v181_v48 = vpop.f32.mrb[8].mxu0  ;;  %v51_v47 = vld [vmem:[%s1573_s2 + $0x30] sm:$0xff] }
 0x103   :  { %v182_v49 = vadd.f32 %v181_v48, %v1303_v46  ;;  %v938_v50 = vpop.f32.mrb[9].mxu0 }
 0x105   :  { %v208_v52 = vsel %vm195_vm3, %v182_v49, -inf }
 0x106   :  { %209 = vmax.xlane.f32.xlu0 %v208_v52  ;;  %v186_v53 = vpop.f32.mrb[10].mxu0 }
 0x107   :  { %v187_v54 = vadd.f32 %v186_v53, %v1310_v51  ;;  %v941_v55 = vpop.f32.mrb[11].mxu0 }
 0x108   :  { %v812_v55 = vld [vmem:[%s1570_s1 + $0x38] sm:$0xff] }
 0x109   :  { %v211_v57 = vsel %vm195_vm3, %v187_v54, -inf }
 0x10a   :  { %212 = vmax.xlane.f32.xlu1 %v211_v57  ;;  %v191_v58 = vpop.f32.mrb[12].mxu0  ;;  %v813_v57 = vld [vmem:[%s1570_s1 + $0x40] sm:$0xff] }
 0x10b   :  { %v192_v59 = vadd.f32 %v191_v58, %v1317_v56  ;;  %v944_v60 = vpop.f32.mrb[13].mxu0 }
 0x10d   :  { %v214_v61 = vsel %vm195_vm3, %v192_v59, -inf }
 0x10e   :  { %215 = vmax.xlane.f32.xlu0 %v214_v61 }
 0x183   :  { %v198_v7 = vpop.xlane.xlu0 %197 }
 0x184   :  { %v217_v8 = vsub.f32 %v162_v29, %v198_v7  ;;  %v1076_v7 = vpack.c.bf16 %v815_v5, %v814_v2 }
 0x186   :  { %v224_v9 = vmul.f32 1.442695, %v217_v8 }
 0x187   :  { %v201_v10 = vpop.xlane.xlu0 %200 }
 0x188   :  { %1103 = vpow2.f32 %v224_v9  ;;  %v218_v11 = vsub.f32 %v167_v34, %v201_v10 }
 0x18a   :  { %v226_v12 = vmul.f32 1.442695, %v218_v11 }
 0x18b   :  { %v204_v13 = vpop.xlane.xlu1 %203 }
 0x18c   :  { %1105 = vpow2.f32 %v226_v12  ;;  %v219_v14 = vsub.f32 %v172_v39, %v204_v13  ;;  %v816_v13 = vld [vmem:[%s1570_s1 + $0x58] sm:$0xff] }
 0x18e   :  { %v228_v15 = vmul.f32 1.442695, %v219_v14  ;;  %v817_v14 = vld [vmem:[%s1570_s1 + $0x60] sm:$0xff] }
 0x18f   :  { %v207_v16 = vpop.xlane.xlu1 %206 }
 0x190   :  { %1107 = vpow2.f32 %v228_v15  ;;  %v220_v17 = vsub.f32 %v177_v44, %v207_v16  ;;  %v1069_v44 = vpack.c.bf16 %v50_v42, %v49_v40  ;;  %v1080_v16 = vpack.c.bf16 %v817_v14, %v816_v13 }
 0x192   :  { %v1104_v18 = vpop.eup %1103  ;;  %v230_v19 = vmul.f32 1.442695, %v220_v17  ;;  %1070 = vmatpush3.bf16.msra.mxu1 %v1069_v44 }
 0x193   :  { %v210_v20 = vpop.xlane.xlu0 %209  ;;  %v238_v21 = vsel %vm195_vm3, %v1104_v18, 0.0  ;;  %957 = vmatprep.subr.mxu1 %v1161_v4 }
 0x194   :  { %1109 = vpow2.f32 %v230_v19  ;;  %v221_v22 = vsub.f32 %v182_v49, %v210_v20  ;;  %239 = vadd.xlane.f32.xlu1 %v238_v21  ;;  %v805_v21 = vld [vmem:[%s1571_s0 + $0x38] sm:$0xff] }
 0x196   :  { %v1106_v23 = vpop.eup %1105  ;;  %v232_v24 = vmul.f32 1.442695, %v221_v22  ;;  %958 = vmatpush3.msra.mxu1 %v51_v47 }
 0x197   :  { %v213_v25 = vpop.xlane.xlu1 %212  ;;  %v241_v26 = vsel %vm195_vm3, %v1106_v23, 0.0  ;;  %1071 = vmatprep.subr.bf16.mxu1 %v1159_v0 }
 0x198   :  { %1111 = vpow2.f32 %v232_v24  ;;  %v222_v28 = vsub.f32 %v187_v54, %v213_v25  ;;  %242 = vadd.xlane.f32.xlu0 %v241_v26  ;;  %v806_v24 = vld [vmem:[%s1571_s0 + $0x40] sm:$0xff]  ;;  %v807_v26 = vld [vmem:[%s1571_s0 + $0x48] sm:$0xff] }
 0x199   :  { %v410_v25 = vmul.f32 0.17677669, %v806_v24 }
 0x19a   :  { %v1108_v29 = vpop.eup %1107  ;;  %v234_v30 = vmul.f32 1.442695, %v222_v28  ;;  %v411_v28 = vmul.f32 0.17677669, %v807_v26 }
 0x19b   :  { %v216_v32 = vpop.xlane.xlu0 %215  ;;  %v244_v33 = vsel %vm195_vm3, %v1108_v29, 0.0 }
 0x19c   :  { %1113 = vpow2.f32 %v234_v30  ;;  %v223_v34 = vsub.f32 %v192_v59, %v216_v32  ;;  %245 = vadd.xlane.f32.xlu1 %v244_v33  ;;  %v1072_v59 = vpack.c.bf16 %v813_v57, %v812_v55  ;;  %v809_v32 = vld [vmem:[%s1571_s0 + $0x58] sm:$0xff] }
 0x19d   :  { %v413_v33 = vmul.f32 0.17677669, %v809_v32 }
 0x19e   :  { %v1110_v35 = vpop.eup %1109  ;;  %v236_v37 = vmul.f32 1.442695, %v223_v34  ;;  %v810_v34 = vld [vmem:[%s1571_s0 + $0x60] sm:$0xff] }
 0x19f   :  { %v247_v38 = vsel %vm195_vm3, %v1110_v35, 0.0 }
 0x1a0   :  { %1115 = vpow2.f32 %v236_v37  ;;  %248 = vadd.xlane.f32.xlu0 %v247_v38  ;;  %v811_v37 = vld [vmem:[%s1571_s0 + $0x68] sm:$0xff] }
 0x1a1   :  { %v415_v38 = vmul.f32 0.17677669, %v811_v37 }
 0x1a2   :  { %v1112_v39 = vpop.eup %1111 }
 0x1a3   :  { %v250_v43 = vsel %vm195_vm3, %v1112_v39, 0.0 }
 0x1a4   :  { %251 = vadd.xlane.f32.xlu1 %v250_v43 }
 0x1a6   :  { %v1114_v45 = vpop.eup %1113 }
 0x1a7   :  { %v253_v48 = vsel %vm195_vm3, %v1114_v45, 0.0 }
 0x1a8   :  { %254 = vadd.xlane.f32.xlu0 %v253_v48 }
 0x1aa   :  { %v1116_v49 = vpop.eup %1115 }
 0x1ab   :  { %v256_v50 = vsel %vm195_vm3, %v1116_v49, 0.0 }
 0x1ac   :  { %257 = vadd.xlane.f32.xlu1 %v256_v50 }
 0x221   :  { %v240_v52 = vpop.xlane.xlu1 %239 }
 0x222   :  { %1117 = vrcp.f32 %v240_v52 }
 0x225   :  { %v243_v53 = vpop.xlane.xlu0 %242 }
 0x226   :  { %1119 = vrcp.f32 %v243_v53 }
 0x229   :  { %v246_v54 = vpop.xlane.xlu1 %245 }
 0x22a   :  { %1121 = vrcp.f32 %v246_v54 }
 0x22c   :  { %v1118_v58 = vpop.eup %1117 }
 0x22d   :  { %v249_v60 = vpop.xlane.xlu0 %248  ;;  %v260_v61 = vmul.f32 %v1118_v58, %v1104_v18 }
 0x22e   :  { %1123 = vrcp.f32 %v249_v60 }
 0x22f   :  { %960 = vmatmul.mubr.msk.f32.vlgmr.msra.gmra.mrb[0].mxu1 %vm195_vm3, %v260_v61 }
 0x230   :  { %v1120_v62 = vpop.eup %1119  ;;  %1074 = vmatpush3.bf16.xpose.msk.msra.mxu1 %vm1196_vm1, %v1072_v59  ;;  %962 = vmatprep.mubr.msk.f32.mxu1 %vm1160_vm2, %v1161_v4 }
 0x231   :  { %v252_v63 = vpop.xlane.xlu1 %251  ;;  %v262_v1 = vmul.f32 %v1120_v62, %v1106_v23  ;;  %1075 = vmatprep.subr.bf16.mxu1 %v1159_v0  ;;  %v409_v23 = vmul.f32 0.17677669, %v805_v21 }
 0x232   :  { %1125 = vrcp.f32 %v252_v63 }
 0x233   :  { %963 = vmatmul.mubr.msk.f32.gmra.mrb[2].mxu1 %vm195_vm3, %v262_v1 }
 0x234   :  { %v1122_v6 = vpop.eup %1121  ;;  %965 = vmatprep.mubr.msk.f32.mxu1 %vm1160_vm2, %v1161_v4 }
 0x235   :  { %v255_v8 = vpop.xlane.xlu0 %254  ;;  %v264_v9 = vmul.f32 %v1122_v6, %v1108_v29  ;;  %v808_v29 = vld [vmem:[%s1571_s0 + $0x50] sm:$0xff] }
 0x236   :  { %1127 = vrcp.f32 %v255_v8  ;;  %v412_v30 = vmul.f32 0.17677669, %v808_v29 }
 0x237   :  { %966 = vmatmul.mubr.msk.f32.gmra.mrb[4].mxu1 %vm195_vm3, %v264_v9 }
 0x238   :  { %v1124_v10 = vpop.eup %1123  ;;  %1078 = vmatpush3.bf16.xpose.msk.msra.mxu1 %vm1196_vm1, %v1076_v7  ;;  %968 = vmatprep.mubr.msk.f32.mxu1 %vm1160_vm2, %v1161_v4 }
 0x239   :  { %v258_v11 = vpop.xlane.xlu1 %257  ;;  %v266_v12 = vmul.f32 %v1124_v10, %v1110_v35  ;;  %1079 = vmatprep.subr.bf16.mxu1 %v1159_v0  ;;  %v414_v35 = vmul.f32 0.17677669, %v810_v34 }
 0x23a   :  { %1129 = vrcp.f32 %v258_v11 }
 0x23b   :  { %969 = vmatmul.mubr.msk.f32.gmra.mrb[6].mxu1 %vm195_vm3, %v266_v12 }
 0x23c   :  { %v1126_v15 = vpop.eup %1125  ;;  %971 = vmatprep.mubr.msk.f32.mxu1 %vm1160_vm2, %v1161_v4 }
 0x23d   :  { %v268_v17 = vmul.f32 %v1126_v15, %v1112_v39 }
 0x23f   :  { %972 = vmatmul.mubr.msk.f32.gmra.mrb[8].mxu1 %vm195_vm3, %v268_v17 }
 0x240   :  { %v1128_v18 = vpop.eup %1127  ;;  %1082 = vmatpush3.bf16.xpose.msk.msra.mxu1 %vm1196_vm1, %v1080_v16  ;;  %974 = vmatprep.mubr.msk.f32.mxu1 %vm1160_vm2, %v1161_v4 }
 0x241   :  { %v270_v19 = vmul.f32 %v1128_v18, %v1114_v45  ;;  %992 = vmatprep.subr.mxu1 %v1161_v4 }
 0x243   :  { %975 = vmatmul.mubr.msk.f32.gmra.mrb[10].mxu1 %vm195_vm3, %v270_v19 }
 0x244   :  { %v1130_v20 = vpop.eup %1129  ;;  %977 = vmatprep.mubr.msk.f32.mxu1 %vm1160_vm2, %v1161_v4 }
 0x245   :  { %v272_v22 = vmul.f32 %v1130_v20, %v1116_v49  ;;  %v820_v20 = vld [vmem:[%s1573_s2 + $0x40] sm:$0xff] }
 0x247   :  { %978 = vmatmul.mubr.msk.f32.gmra.mrb[12].mxu1 %vm195_vm3, %v272_v22 }
 0x248   :  { %993 = vmatpush3.xpose.msk.msra.mxu1 %vm52_vm0, %v818_v3  ;;  %994 = vmatprep.mubr.msk.f32.mxu1 %vm1160_vm2, %v1161_v4 }
 0x249   :  { %1092 = vmatprep.subr.bf16.mxu1 %v1159_v0 }
 0x24b   :  { %995 = vmatmul.mubr.msk.f32.vlgmr.msra.gmra.mrb[14].mxu1 %vm52_vm0, %v409_v23 }
 0x24c   :  { %997 = vmatprep.mubr.msk.f32.mxu1 %vm1160_vm2, %v1161_v4 }
 0x24f   :  { %998 = vmatmul.mubr.msk.f32.gmra.mrb[16].mxu1 %vm52_vm0, %v410_v25 }
 0x250   :  { %1000 = vmatprep.mubr.msk.f32.mxu1 %vm1160_vm2, %v1161_v4 }
 0x253   :  { %1001 = vmatmul.mubr.msk.f32.gmra.mrb[18].mxu1 %vm52_vm0, %v411_v28 }
 0x254   :  { %1003 = vmatprep.mubr.msk.f32.mxu1 %vm1160_vm2, %v1161_v4 }
 0x257   :  { %1004 = vmatmul.mubr.msk.f32.gmra.mrb[20].mxu1 %vm52_vm0, %v412_v30 }
 0x258   :  { %1006 = vmatprep.mubr.msk.f32.mxu1 %vm1160_vm2, %v1161_v4 }
 0x25b   :  { %1007 = vmatmul.mubr.msk.f32.gmra.mrb[22].mxu1 %vm52_vm0, %v413_v33 }
 0x25c   :  { %1009 = vmatprep.mubr.msk.f32.mxu1 %vm1160_vm2, %v1161_v4 }
 0x25f   :  { %1010 = vmatmul.mubr.msk.f32.gmra.mrb[24].mxu1 %vm52_vm0, %v414_v35 }
 0x260   :  { %1012 = vmatprep.mubr.msk.f32.mxu1 %vm1160_vm2, %v1161_v4 }
 0x263   :  { %1013 = vmatmul.mubr.msk.f32.gmra.mrb[26].mxu1 %vm52_vm0, %v415_v38 }
 0x264   :  { %1047 = vmatprep.mubr.msk.f32.mxu1 %vm1160_vm2, %v1161_v4 }
 0x302   :  { %v360_v39 = vpop.f32.mrb[0].mxu1 }
 0x303   :  { %394 = vst.msk [vmem:[%s1574_s4] sm:$0xff] %vm52_vm0, %v360_v39  ;;  %v961_v40 = vpop.f32.mrb[1].mxu1 }
 0x306   :  { %v365_v42 = vpop.f32.mrb[2].mxu1 }
 0x307   :  { %395 = vst.msk [vmem:[%s1574_s4 + $0x8] sm:$0xff] %vm52_vm0, %v365_v42  ;;  %v964_v43 = vpop.f32.mrb[3].mxu1 }
 0x30a   :  { %v370_v44 = vpop.f32.mrb[4].mxu1 }
 0x30b   :  { %396 = vst.msk [vmem:[%s1574_s4 + $0x10] sm:$0xff] %vm52_vm0, %v370_v44  ;;  %v967_v45 = vpop.f32.mrb[5].mxu1 }
 0x30e   :  { %v375_v47 = vpop.f32.mrb[6].mxu1 }
 0x30f   :  { %397 = vst.msk [vmem:[%s1574_s4 + $0x18] sm:$0xff] %vm52_vm0, %v375_v47  ;;  %v970_v48 = vpop.f32.mrb[7].mxu1 }
 0x312   :  { %v380_v49 = vpop.f32.mrb[8].mxu1 }
 0x313   :  { %398 = vst.msk [vmem:[%s1574_s4 + $0x20] sm:$0xff] %vm52_vm0, %v380_v49  ;;  %v973_v50 = vpop.f32.mrb[9].mxu1 }
 0x316   :  { %v385_v52 = vpop.f32.mrb[10].mxu1 }
 0x317   :  { %399 = vst.msk [vmem:[%s1574_s4 + $0x28] sm:$0xff] %vm52_vm0, %v385_v52  ;;  %v976_v53 = vpop.f32.mrb[11].mxu1 }
 0x31a   :  { %v390_v54 = vpop.f32.mrb[12].mxu1 }
 0x31b   :  { %400 = vst.msk [vmem:[%s1574_s4 + $0x30] sm:$0xff] %vm52_vm0, %v390_v54  ;;  %v979_v55 = vpop.f32.mrb[13].mxu1 }
 0x31e   :  { %v540_v57 = vpop.f32.mrb[14].mxu1 }
 0x31f   :  { %v541_v58 = vadd.f32 %v540_v57, %v1276_v27  ;;  %v996_v59 = vpop.f32.mrb[15].mxu1 }
 0x321   :  { %v574_v60 = vsel %vm195_vm3, %v541_v58, -inf }
 0x322   :  { %575 = vmax.xlane.f32.xlu0 %v574_v60  ;;  %v545_v61 = vpop.f32.mrb[16].mxu1 }
 0x323   :  { %v546_v62 = vadd.f32 %v545_v61, %v1282_v31  ;;  %v999_v63 = vpop.f32.mrb[17].mxu1  ;;  %v823_v61 = vld [vmem:[%s1573_s2 + $0x58] sm:$0xff] }
 0x325   :  { %v577_v1 = vsel %vm195_vm3, %v546_v62, -inf }
 0x326   :  { %578 = vmax.xlane.f32.xlu1 %v577_v1  ;;  %v550_v2 = vpop.f32.mrb[18].mxu1 }
 0x327   :  { %v551_v5 = vadd.f32 %v550_v2, %v1289_v36  ;;  %v1002_v6 = vpop.f32.mrb[19].mxu1 }
 0x329   :  { %v580_v7 = vsel %vm195_vm3, %v551_v5, -inf }
 0x32a   :  { %581 = vmax.xlane.f32.xlu0 %v580_v7  ;;  %v555_v8 = vpop.f32.mrb[20].mxu1 }
 0x32b   :  { %v556_v27 = vadd.f32 %v555_v8, %v1296_v41  ;;  %v1005_v9 = vpop.f32.mrb[21].mxu1 }
 0x32d   :  { %v583_v10 = vsel %vm195_vm3, %v556_v27, -inf }
 0x32e   :  { %584 = vmax.xlane.f32.xlu1 %v583_v10  ;;  %v560_v11 = vpop.f32.mrb[22].mxu1 }
 0x32f   :  { %v561_v31 = vadd.f32 %v560_v11, %v1303_v46  ;;  %v1008_v12 = vpop.f32.mrb[23].mxu1  ;;  %v819_v46 = vld [vmem:[%s1573_s2 + $0x38] sm:$0xff] }
 0x330   :  { %v1084_v21 = vpack.c.bf16 %v820_v20, %v819_v46 }
 0x331   :  { %v586_v13 = vsel %vm195_vm3, %v561_v31, -inf }
 0x332   :  { %587 = vmax.xlane.f32.xlu0 %v586_v13  ;;  %v565_v14 = vpop.f32.mrb[24].mxu1  ;;  %1085 = vmatpush3.bf16.msra.mxu0 %v1084_v21 }
 0x333   :  { %v566_v36 = vadd.f32 %v565_v14, %v1310_v51  ;;  %v1011_v15 = vpop.f32.mrb[25].mxu1  ;;  %v821_v51 = vld [vmem:[%s1573_s2 + $0x48] sm:$0xff]  ;;  %1096 = vmatpush3.bf16.msra.mxu1 %v1084_v21  ;;  %1086 = vmatprep.subr.bf16.mxu0 %v1159_v0 }
 0x334   :  { %1093 = vmatprep.subr.bf16.mxu1 %v1159_v0 }
 0x335   :  { %v589_v16 = vsel %vm195_vm3, %v566_v36, -inf }
 0x336   :  { %590 = vmax.xlane.f32.xlu1 %v589_v16  ;;  %v570_v17 = vpop.f32.mrb[26].mxu1 }
 0x337   :  { %v571_v41 = vadd.f32 %v570_v17, %v1317_v56  ;;  %v1014_v18 = vpop.f32.mrb[27].mxu1  ;;  %v822_v56 = vld [vmem:[%s1573_s2 + $0x50] sm:$0xff] }
 0x338   :  { %v1087_v22 = vpack.c.bf16 %v822_v56, %v821_v51 }
 0x339   :  { %v592_v19 = vsel %vm195_vm3, %v571_v41, -inf }
 0x33a   :  { %593 = vmax.xlane.f32.xlu0 %v592_v19  ;;  %1088 = vmatpush3.bf16.msra.mxu0 %v1087_v22 }
 0x33b   :  { %1097 = vmatpush3.bf16.msra.mxu1 %v1087_v22  ;;  %1089 = vmatprep.subr.bf16.mxu0 %v1159_v0 }
 0x33c   :  { %1094 = vmatprep.subr.bf16.mxu1 %v1159_v0 }
 0x3af   :  { %v576_v3 = vpop.xlane.xlu0 %575 }
 0x3b0   :  { %v595_v23 = vsub.f32 %v541_v58, %v576_v3 }
 0x3b2   :  { %v602_v24 = vmul.f32 1.442695, %v595_v23 }
 0x3b3   :  { %v579_v25 = vpop.xlane.xlu1 %578 }
 0x3b4   :  { %1131 = vpow2.f32 %v602_v24  ;;  %v596_v26 = vsub.f32 %v546_v62, %v579_v25  ;;  %v824_v62 = vld [vmem:[%s1573_s2 + $0x60] sm:$0xff] }
 0x3b5   :  { %v1090_v63 = vpack.c.bf16 %v824_v62, %v823_v61 }
 0x3b6   :  { %v604_v28 = vmul.f32 1.442695, %v596_v26 }
 0x3b7   :  { %v582_v29 = vpop.xlane.xlu0 %581  ;;  %1091 = vmatpush3.bf16.msra.mxu0 %v1090_v63  ;;  %1098 = vmatpush3.bf16.msra.mxu1 %v1090_v63 }
 0x3b8   :  { %1133 = vpow2.f32 %v604_v28  ;;  %v597_v30 = vsub.f32 %v551_v5, %v582_v29  ;;  %1027 = vmatprep.subr.mxu0 %v1161_v4  ;;  %1095 = vmatprep.subr.mxu1 %v1161_v4  ;;  %v825_v5 = vld [vmem:[%s1573_s2 + $0x68] sm:$0xff] }
 0x3ba   :  { %v606_v32 = vmul.f32 1.442695, %v597_v30 }
 0x3bb   :  { %v585_v33 = vpop.xlane.xlu1 %584  ;;  %1028 = vmatpush3.msra.mxu0 %v825_v5  ;;  %1099 = vmatpush3.msra.mxu1 %v825_v5 }
 0x3bc   :  { %1135 = vpow2.f32 %v606_v32  ;;  %v598_v34 = vsub.f32 %v556_v27, %v585_v33 }
 0x3be   :  { %v1132_v35 = vpop.eup %1131  ;;  %v608_v37 = vmul.f32 1.442695, %v598_v34 }
 0x3bf   :  { %v588_v38 = vpop.xlane.xlu0 %587  ;;  %v616_v39 = vsel %vm195_vm3, %v1132_v35, 0.0 }
 0x3c0   :  { %1137 = vpow2.f32 %v608_v37  ;;  %v599_v0 = vsub.f32 %v561_v31, %v588_v38  ;;  %617 = vadd.xlane.f32.xlu1 %v616_v39 }
 0x3c2   :  { %v1134_v40 = vpop.eup %1133  ;;  %v610_v42 = vmul.f32 1.442695, %v599_v0 }
 0x3c3   :  { %v591_v43 = vpop.xlane.xlu1 %590  ;;  %v619_v44 = vsel %vm195_vm3, %v1134_v40, 0.0 }
 0x3c4   :  { %1139 = vpow2.f32 %v610_v42  ;;  %v600_v45 = vsub.f32 %v566_v36, %v591_v43  ;;  %620 = vadd.xlane.f32.xlu0 %v619_v44 }
 0x3c6   :  { %v1136_v47 = vpop.eup %1135  ;;  %v612_v48 = vmul.f32 1.442695, %v600_v45 }
 0x3c7   :  { %v594_v49 = vpop.xlane.xlu0 %593  ;;  %v622_v50 = vsel %vm195_vm3, %v1136_v47, 0.0 }
 0x3c8   :  { %1141 = vpow2.f32 %v612_v48  ;;  %v601_v52 = vsub.f32 %v571_v41, %v594_v49  ;;  %623 = vadd.xlane.f32.xlu1 %v622_v50 }
 0x3ca   :  { %v1138_v53 = vpop.eup %1137  ;;  %v614_v54 = vmul.f32 1.442695, %v601_v52 }
 0x3cb   :  { %v625_v55 = vsel %vm195_vm3, %v1138_v53, 0.0 }
 0x3cc   :  { %1143 = vpow2.f32 %v614_v54  ;;  %626 = vadd.xlane.f32.xlu0 %v625_v55 }
 0x3ce   :  { %v1140_v57 = vpop.eup %1139 }
 0x3cf   :  { %v628_v58 = vsel %vm195_vm3, %v1140_v57, 0.0 }
 0x3d0   :  { %629 = vadd.xlane.f32.xlu1 %v628_v58 }
 0x3d2   :  { %v1142_v59 = vpop.eup %1141 }
 0x3d3   :  { %v631_v60 = vsel %vm195_vm3, %v1142_v59, 0.0 }
 0x3d4   :  { %632 = vadd.xlane.f32.xlu0 %v631_v60 }
 0x3d6   :  { %v1144_v1 = vpop.eup %1143 }
 0x3d7   :  { %v634_v2 = vsel %vm195_vm3, %v1144_v1, 0.0 }
 0x3d8   :  { %635 = vadd.xlane.f32.xlu1 %v634_v2 }
 0x44d   :  { %v618_v6 = vpop.xlane.xlu1 %617 }
 0x44e   :  { %1145 = vrcp.f32 %v618_v6 }
 0x451   :  { %v621_v7 = vpop.xlane.xlu0 %620 }
 0x452   :  { %1147 = vrcp.f32 %v621_v7 }
 0x455   :  { %v624_v8 = vpop.xlane.xlu1 %623 }
 0x456   :  { %1149 = vrcp.f32 %v624_v8 }
 0x458   :  { %v1146_v27 = vpop.eup %1145 }
 0x459   :  { %v638_v9 = vmul.f32 %v1146_v27, %v1132_v35  ;;  %v627_v10 = vpop.xlane.xlu0 %626 }
 0x45a   :  { %1151 = vrcp.f32 %v627_v10 }
 0x45b   :  { %1030 = vmatmul.mubr.msk.f32.vlgmr.msra.gmra.mrb[14].mxu0 %vm195_vm3, %v638_v9 }
 0x45c   :  { %v1148_v11 = vpop.eup %1147  ;;  %1032 = vmatprep.mubr.msk.f32.mxu0 %vm1160_vm2, %v1161_v4 }
 0x45d   :  { %v630_v31 = vpop.xlane.xlu1 %629  ;;  %v640_v12 = vmul.f32 %v1148_v11, %v1134_v40 }
 0x45e   :  { %1153 = vrcp.f32 %v630_v31 }
 0x45f   :  { %1033 = vmatmul.mubr.msk.f32.gmra.mrb[16].mxu0 %vm195_vm3, %v640_v12 }
 0x460   :  { %v1150_v13 = vpop.eup %1149  ;;  %1035 = vmatprep.mubr.msk.f32.mxu0 %vm1160_vm2, %v1161_v4 }
 0x461   :  { %v633_v14 = vpop.xlane.xlu0 %632  ;;  %v642_v36 = vmul.f32 %v1150_v13, %v1136_v47 }
 0x462   :  { %1155 = vrcp.f32 %v633_v14 }
 0x463   :  { %1036 = vmatmul.mubr.msk.f32.gmra.mrb[18].mxu0 %vm195_vm3, %v642_v36 }
 0x464   :  { %v1152_v15 = vpop.eup %1151  ;;  %1038 = vmatprep.mubr.msk.f32.mxu0 %vm1160_vm2, %v1161_v4 }
 0x465   :  { %v636_v16 = vpop.xlane.xlu1 %635  ;;  %v644_v17 = vmul.f32 %v1152_v15, %v1138_v53 }
 0x466   :  { %1157 = vrcp.f32 %v636_v16 }
 0x467   :  { %1039 = vmatmul.mubr.msk.f32.gmra.mrb[20].mxu0 %vm195_vm3, %v644_v17 }
 0x468   :  { %v1154_v41 = vpop.eup %1153  ;;  %1041 = vmatprep.mubr.msk.f32.mxu0 %vm1160_vm2, %v1161_v4 }
 0x469   :  { %v646_v18 = vmul.f32 %v1154_v41, %v1140_v57 }
 0x46b   :  { %1042 = vmatmul.mubr.msk.f32.gmra.mrb[22].mxu0 %vm195_vm3, %v646_v18 }
 0x46c   :  { %v1156_v19 = vpop.eup %1155  ;;  %1044 = vmatprep.mubr.msk.f32.mxu0 %vm1160_vm2, %v1161_v4 }
 0x46d   :  { %v648_v46 = vmul.f32 %v1156_v19, %v1142_v59 }
 0x46f   :  { %1045 = vmatmul.mubr.msk.f32.gmra.mrb[24].mxu0 %vm195_vm3, %v648_v46 }
 0x470   :  { %v1158_v20 = vpop.eup %1157 }
 0x471   :  { %v650_v51 = vmul.f32 %v1158_v20, %v1144_v1 }
 0x473   :  { %1048 = vmatmul.mubr.msk.f32.vlgmr.msra.gmra.mrb[28].mxu1 %vm195_vm3, %v650_v51 }
 0x52e   :  { %v738_v21 = vpop.f32.mrb[14].mxu0 }
 0x52f   :  { %847 = vst.msk [vmem:[%s1574_s4 + $0x38] sm:$0xff] %vm52_vm0, %v738_v21  ;;  %v1031_v56 = vpop.f32.mrb[15].mxu0 }
 0x532   :  { %v743_v22 = vpop.f32.mrb[16].mxu0 }
 0x533   :  { %848 = vst.msk [vmem:[%s1574_s4 + $0x40] sm:$0xff] %vm52_vm0, %v743_v22  ;;  %v1034_v4 = vpop.f32.mrb[17].mxu0 }
 0x536   :  { %v748_v3 = vpop.f32.mrb[18].mxu0 }
 0x537   :  { %849 = vst.msk [vmem:[%s1574_s4 + $0x48] sm:$0xff] %vm52_vm0, %v748_v3  ;;  %v1037_v23 = vpop.f32.mrb[19].mxu0 }
 0x53a   :  { %v753_v24 = vpop.f32.mrb[20].mxu0 }
 0x53b   :  { %850 = vst.msk [vmem:[%s1574_s4 + $0x50] sm:$0xff] %vm52_vm0, %v753_v24  ;;  %v1040_v25 = vpop.f32.mrb[21].mxu0 }
 0x53e   :  { %v758_v26 = vpop.f32.mrb[22].mxu0 }
 0x53f   :  { %851 = vst.msk [vmem:[%s1574_s4 + $0x58] sm:$0xff] %vm52_vm0, %v758_v26  ;;  %v1043_v28 = vpop.f32.mrb[23].mxu0 }
 0x542   :  { %v763_v29 = vpop.f32.mrb[24].mxu0 }
 0x543   :  { %852 = vst.msk [vmem:[%s1574_s4 + $0x60] sm:$0xff] %vm52_vm0, %v763_v29  ;;  %v1046_v30 = vpop.f32.mrb[25].mxu0 }
 0x546   :  { %v768_v32 = vpop.f32.mrb[28].mxu1 }
 0x547   :  { %853 = vst.msk [vmem:[%s1574_s4 + $0x68] sm:$0xff] %vm52_vm0, %v768_v32  ;;  %v1049_v33 = vpop.f32.mrb[29].mxu1 }

</bundles_post_ra>
